<compile_context>
chip_gen: v7x
topology: tpu7x:2x2x1
jax: 0.10.0
libtpu: 0.0.40
codegen_flags: <defaults>
</compile_context>

<pallas_src>
import functools

import jax
import jax.numpy as jnp
from jax.experimental import pallas as pl
from jax.experimental.pallas import tpu as pltpu

_LANE = 128      # TPU lane width (last dim)
_SUBLANE = 8     # TPU sublane count (second-to-last dim)


def _round_up(n: int, m: int) -> int:
    return ((n + m - 1) // m) * m


def _vmem_capacity_bytes() -> int:
    """Physical per-core VMEM; conservative (v7x 64 MiB) if undetectable."""
    try:
        info = pltpu.get_tpu_info()
        for name in ("vmem_capacity_bytes", "vmem_bytes", "vmem_size_bytes"):
            v = getattr(info, name, None)
            if v:
                return int(v)
    except Exception:
        pass
    return 64 << 20


def _num_tensorcores() -> int:
    """TensorCores per chip (2 on v7x, 1 on v5e/v6e); 1 if undetectable."""
    try:
        info = pltpu.get_tpu_info()
        for name in ("tensorcores_per_chip", "num_tensorcores", "num_cores_per_chip"):
            v = getattr(info, name, None)
            if v:
                return int(v)
    except Exception:
        pass
    return 1


def _pick_tile(dim: int, candidates=(512, 256, 128)) -> int:
    for c in candidates:
        if dim % c == 0:
            return c
    return dim


# ------------------------------ Fused kernel ------------------------------- #
def _mlp_fused_kernel(*refs, num_layers: int, compute_dtype):
    """Whole-MLP body for one batch tile.

    refs = (x_ref, w0_ref, b0_ref, ..., w{L-1}_ref, b{L-1}_ref, o_ref)
      x_ref : (TM, F0_pad)      bf16/f32  VMEM
      w_i   : (Fi_pad, Fo_pad)  bf16      VMEM, resident, single-buffered
      b_i   : (1, Fo_pad)       f32       VMEM, resident, single-buffered
      o_ref : (TM, Fout_pad)    bf16      VMEM
    Intermediates never leave VMEM/vregs.
    """
    x_ref = refs[0]
    o_ref = refs[-1]
    wb_refs = refs[1:-1]

    h = x_ref[...]
    for i in range(num_layers):
        w = wb_refs[2 * i][...]
        b = wb_refs[2 * i + 1][...]
        # MXU matmul in bf16 with f32 accumulation; bias added post-accumulate.
        y = jnp.dot(h.astype(w.dtype), w, preferred_element_type=jnp.float32) + b
        if i < num_layers - 1:
            # ReLU; Dropout(p=0.0) == identity. bf16 immediately to halve live bytes.
            h = jnp.maximum(y, 0.0).astype(compute_dtype)
        else:
            h = y
    o_ref[...] = h.astype(o_ref.dtype)


# ------------------- Fallback: per-layer K-tiled matmul --------------------- #
def _linear_tiled_kernel(x_ref, w_ref, b_ref, o_ref, acc_ref, *, apply_relu: bool):
    @pl.when(pl.program_id(2) == 0)
    def _():
        acc_ref[...] = jnp.zeros_like(acc_ref)

    acc_ref[...] += jnp.dot(x_ref[...].astype(w_ref.dtype), w_ref[...],
                            preferred_element_type=jnp.float32)

    @pl.when(pl.program_id(2) == pl.num_programs(2) - 1)
    def _():
        y = acc_ref[...] + b_ref[...]
        if apply_relu:
            y = jnp.maximum(y, 0.0)
        o_ref[...] = y.astype(o_ref.dtype)


def _linear_tiled(x_pad, w_p, b_p, *, apply_relu, out_dtype, tm, vmem_limit):
    """One Linear(+ReLU) layer as a K-tiled 3-D grid (used when weights > VMEM)."""
    b_pad, fin_pad = x_pad.shape
    fout_pad = w_p.shape[1]
    tk = _pick_tile(fin_pad)
    tn = _pick_tile(fout_pad)
    grid = (b_pad // tm, fout_pad // tn, fin_pad // tk)
    return pl.pallas_call(
        functools.partial(_linear_tiled_kernel, apply_relu=apply_relu),
        out_shape=jax.ShapeDtypeStruct((b_pad, fout_pad), out_dtype),
        grid_spec=pltpu.PrefetchScalarGridSpec(
            num_scalar_prefetch=0,
            grid=grid,
            in_specs=[pl.BlockSpec((tm, tk), lambda i, j, k: (i, k)),
                      pl.BlockSpec((tk, tn), lambda i, j, k: (k, j)),
                      pl.BlockSpec((1, tn), lambda i, j, k: (0, j))],
            out_specs=pl.BlockSpec((tm, tn), lambda i, j, k: (i, j)),
            scratch_shapes=[pltpu.VMEM((tm, tn), jnp.float32)]),
        compiler_params=pltpu.CompilerParams(
            dimension_semantics=("parallel", "parallel", "arbitrary"),
            vmem_limit_bytes=int(vmem_limit)),
    )(x_pad, w_p, b_p)


# ----------------------------- VMEM budgeting ------------------------------ #
def _fused_vmem_footprint(tm, dims_pad, x_itemsize, out_itemsize):
    # Weights bf16 + biases f32, single-buffered (pl.Buffered(1)).
    w_bytes = sum(fi * fo * 2 + fo * 4
                  for fi, fo in zip(dims_pad[:-1], dims_pad[1:]))
    x_tile = 2 * tm * dims_pad[0] * x_itemsize       # double-buffered input tile
    o_tile = 2 * tm * dims_pad[-1] * out_itemsize    # double-buffered output tile
    act = 3 * tm * max(dims_pad) * 4                 # live f32 acc + bf16 copy headroom
    return w_bytes + x_tile + o_tile + act


# ------------------------------ Host wrapper ------------------------------- #
def mlp_forward(x, padded_params, *, output_size: int,
                out_dtype=jnp.bfloat16, compute_dtype=jnp.bfloat16,
                force_fallback: bool = False):
    """Run the MLP. `padded_params` are pre-padded/cast at init time."""
    num_layers = len(padded_params)
    batch, fin = x.shape
    dims_pad = [padded_params[0][0].shape[0]] + [w.shape[1] for (w, _) in padded_params]
    fin_pad, fout_pad = dims_pad[0], dims_pad[-1]
    out_isz = jnp.dtype(out_dtype).itemsize

    vmem_cap = _vmem_capacity_bytes()
    vmem_budget = int(vmem_cap * 0.75)   # ~48 MiB on v7x, ~96 MiB on v5e/v6e

    # Batch tile: fill the 256-tall MXU (v6e/v7x) when batch & VMEM allow,
    # else 128, else the smallest sublane-aligned tile covering the batch.
    if batch >= _LANE:
        tm_cands = [t for t in (512, 256, 128) if t <= batch]
    else:
        tm_cands = [_round_up(batch, _SUBLANE)]

    tm = None
    for cand in tm_cands:
        if _fused_vmem_footprint(cand, dims_pad, 4, out_isz) <= vmem_budget:
            tm = cand
            break

    use_fallback = force_fallback or tm is None

    if use_fallback:
        # Weights outgrow VMEM (or forced): per-layer K-tiled matmuls, bf16
        # activations round-trip HBM between layers.
        tm_fb = _round_up(batch, _SUBLANE) if batch < _LANE else _LANE
        b_pad = _round_up(batch, tm_fb)
        h = x.astype(compute_dtype)
        if (b_pad, fin_pad) != h.shape:
            h = jnp.pad(h, ((0, b_pad - batch), (0, fin_pad - h.shape[1])))
        for i, (w_p, b_p) in enumerate(padded_params):
            last = (i == num_layers - 1)
            h = _linear_tiled(h, w_p, b_p,
                              apply_relu=not last,
                              out_dtype=(out_dtype if last else compute_dtype),
                              tm=tm_fb, vmem_limit=vmem_budget)
        return h[:batch, :output_size]

    # ------------------------------ Fused path ------------------------------ #
    b_pad = _round_up(batch, tm)
    if (b_pad, fin_pad) != x.shape:
        # Single fused cast+pad pass over x (no separate astype pass).
        x = jnp.pad(x.astype(compute_dtype),
                    ((0, b_pad - batch), (0, fin_pad - fin)))
    # else: feed x unchanged; the kernel casts to the MXU dtype on the fly.

    in_specs = [pl.BlockSpec((tm, fin_pad), lambda i: (i, 0))]
    flat_args = [x]
    for (w_p, b_p) in padded_params:
        # index_map -> (0,0): VMEM-resident across batch tiles; Buffered(1) avoids
        # a useless double buffer for blocks that never change.
        in_specs.append(pl.BlockSpec(w_p.shape, lambda i: (0, 0),
                                     pipeline_mode=pl.Buffered(1)))
        in_specs.append(pl.BlockSpec(b_p.shape, lambda i: (0, 0),
                                     pipeline_mode=pl.Buffered(1)))
        flat_args += [w_p, b_p]

    footprint = _fused_vmem_footprint(tm, dims_pad, x.dtype.itemsize, out_isz)
    vmem_limit = int(min(vmem_budget, max(int(footprint * 1.25), 32 << 20)))

    grid_steps = b_pad // tm
    ncores = _num_tensorcores()
    if ncores > 1 and grid_steps >= 2 * ncores and grid_steps % ncores == 0:
        # v7x: real dual-TensorCore sharding of the batch axis.
        dim_sem = (pltpu.CORE_PARALLEL,)
    else:
        dim_sem = ("parallel",)

    out = pl.pallas_call(
        functools.partial(_mlp_fused_kernel, num_layers=num_layers,
                          compute_dtype=compute_dtype),
        out_shape=jax.ShapeDtypeStruct((b_pad, fout_pad), out_dtype),
        grid_spec=pltpu.PrefetchScalarGridSpec(
            num_scalar_prefetch=0,
            grid=(grid_steps,),
            in_specs=in_specs,
            out_specs=pl.BlockSpec((tm, fout_pad), lambda i: (i, 0)),
        ),
        compiler_params=pltpu.CompilerParams(
            dimension_semantics=dim_sem,
            vmem_limit_bytes=vmem_limit),
    )(*flat_args)

    return out[:batch, :output_size]


# ----------------------- Parameter init (one-time layout) ------------------ #
def init_general_model_params(key, input_size, hidden_size, output_size,
                              num_hidden=2, param_dtype=jnp.bfloat16):
    """nn.Linear-style init; returns (raw f32 params, padded/cast kernel params).

    Weights are stored (in, out) so the kernel computes x @ W, zero-padded to
    128-lane-dense tiles and cast to bf16 once here (not per forward call).
    Biases are stored as (1, Fout_pad) f32 (added after the f32 accumulate).
    """
    dims = [input_size] + [hidden_size] * (num_hidden - 1) + [output_size]
    raw, padded = [], []
    for i in range(len(dims) - 1):
        fan_in, fan_out = dims[i], dims[i + 1]
        key, kw, kb = jax.random.split(key, 3)
        bound = 1.0 / (fan_in ** 0.5)
        w = jax.random.uniform(kw, (fan_in, fan_out), jnp.float32, -bound, bound)
        b = jax.random.uniform(kb, (fan_out,), jnp.float32, -bound, bound)
        raw.append((w, b))

        fin_p = _round_up(fan_in, _LANE)
        fout_p = _round_up(fan_out, _LANE)
        w_p = jnp.zeros((fin_p, fout_p), param_dtype)
        w_p = w_p.at[:fan_in, :fan_out].set(w.astype(param_dtype))
        b_p = jnp.zeros((1, fout_p), jnp.float32).at[0, :fan_out].set(b)
        padded.append((w_p, b_p))
    return raw, padded


# ----------------------------------- main ---------------------------------- #
if __name__ == "__main__":
    # Small shapes consistent with the module:
    # Linear(16,32) -> ReLU -> Linear(32,32) -> ReLU -> Linear(32,8)
    input_size, hidden_size, output_size = 16, 32, 8
    num_hidden = 3
    batch = 4

    key = jax.random.PRNGKey(0)
    key, kx = jax.random.split(key)
    x = jax.random.normal(kx, (batch, input_size), jnp.float32)

    raw_params, padded_params = init_general_model_params(
        key, input_size, hidden_size, output_size, num_hidden=num_hidden)

    # Fused (all-weights-resident) path.
    fwd = jax.jit(functools.partial(mlp_forward, output_size=output_size))
    out = jax.block_until_ready(fwd(x, padded_params))

    # Plain-JAX reference on the same bf16-weight / f32-accumulate path.
    ref = x
    n_layers = len(raw_params)
    for i, (w, b) in enumerate(raw_params):
        ref = jnp.dot(ref.astype(jnp.bfloat16), w.astype(jnp.bfloat16),
                      preferred_element_type=jnp.float32) + b
        if i < n_layers - 1:
            ref = jnp.maximum(ref, 0.0)

    assert out.shape == (batch, output_size)
    assert jnp.allclose(out.astype(jnp.float32), ref, atol=3e-2, rtol=3e-2)

    # Also exercise the K-tiled fallback path (used when weights outgrow VMEM).
    fwd_fb = jax.jit(functools.partial(mlp_forward, output_size=output_size,
                                       force_fallback=True))
    out_fb = jax.block_until_ready(fwd_fb(x, padded_params))
    assert out_fb.shape == (batch, output_size)
    assert jnp.allclose(out_fb.astype(jnp.float32), ref, atol=3e-2, rtol=3e-2)

    print("KERNEL_OK")
</pallas_src>

<mosaic_0001>
module attributes {stable_mosaic.version = 11 : i64} {
  func.func @_mlp_fused_kernel(%arg0: i32, %arg1: memref<8x128xbf16, #tpu.memory_space<vmem>>, %arg2: memref<128x128xbf16, #tpu.memory_space<vmem>>, %arg3: memref<1x128xf32, #tpu.memory_space<vmem>>, %arg4: memref<128x128xbf16, #tpu.memory_space<vmem>>, %arg5: memref<1x128xf32, #tpu.memory_space<vmem>>, %arg6: memref<128x128xbf16, #tpu.memory_space<vmem>>, %arg7: memref<1x128xf32, #tpu.memory_space<vmem>>, %arg8: memref<8x128xbf16, #tpu.memory_space<vmem>>) attributes {dimension_semantics = [#tpu.dimension_semantics<parallel>], iteration_bounds = array<i64: 1>, scalar_prefetch = 0 : i64, scratch_operands = 0 : i64, tpu.core_type = #tpu.core_type<tc>, window_params = [{transform_indices = @transform_0, window_bounds = array<i64: 8, 128>}, {pipeline_mode = #tpu.pipeline_mode<synchronous>, transform_indices = @transform_1, window_bounds = array<i64: 128, 128>}, {pipeline_mode = #tpu.pipeline_mode<synchronous>, transform_indices = @transform_2, window_bounds = array<i64: 1, 128>}, {pipeline_mode = #tpu.pipeline_mode<synchronous>, transform_indices = @transform_3, window_bounds = array<i64: 128, 128>}, {pipeline_mode = #tpu.pipeline_mode<synchronous>, transform_indices = @transform_4, window_bounds = array<i64: 1, 128>}, {pipeline_mode = #tpu.pipeline_mode<synchronous>, transform_indices = @transform_5, window_bounds = array<i64: 128, 128>}, {pipeline_mode = #tpu.pipeline_mode<synchronous>, transform_indices = @transform_6, window_bounds = array<i64: 1, 128>}, {transform_indices = @transform_7, window_bounds = array<i64: 8, 128>}]} {
    %c0 = arith.constant 0 : index
    %c0_0 = arith.constant 0 : index
    %0 = vector.load %arg1[%c0, %c0_0] : memref<8x128xbf16, #tpu.memory_space<vmem>>, vector<8x128xbf16>
    %c0_1 = arith.constant 0 : index
    %c0_2 = arith.constant 0 : index
    %1 = vector.load %arg2[%c0_1, %c0_2] : memref<128x128xbf16, #tpu.memory_space<vmem>>, vector<128x128xbf16>
    %c0_3 = arith.constant 0 : index
    %c0_4 = arith.constant 0 : index
    %2 = vector.load %arg3[%c0_3, %c0_4] : memref<1x128xf32, #tpu.memory_space<vmem>>, vector<1x128xf32>
    %cst = arith.constant dense<0.000000e+00> : vector<8x128xf32>
    %3 = tpu.matmul %0, %1, %cst {dimension_numbers = #tpu.dot_dimension_numbers<[1], [0], [0], [1], [0, 0, 1, 1], [], []>} : vector<8x128xbf16>, vector<128x128xbf16>, vector<8x128xf32> -> vector<8x128xf32>
    %4 = vector.broadcast %2 : vector<1x128xf32> to vector<8x128xf32>
    %5 = arith.addf %3, %4 : vector<8x128xf32>
    %cst_5 = arith.constant 0.000000e+00 : f32
    %6 = vector.broadcast %cst_5 : f32 to vector<8x128xf32>
    %7 = arith.maximumf %5, %6 : vector<8x128xf32>
    %8 = arith.truncf %7 : vector<8x128xf32> to vector<8x128xbf16>
    %c0_6 = arith.constant 0 : index
    %c0_7 = arith.constant 0 : index
    %9 = vector.load %arg4[%c0_6, %c0_7] : memref<128x128xbf16, #tpu.memory_space<vmem>>, vector<128x128xbf16>
    %c0_8 = arith.constant 0 : index
    %c0_9 = arith.constant 0 : index
    %10 = vector.load %arg5[%c0_8, %c0_9] : memref<1x128xf32, #tpu.memory_space<vmem>>, vector<1x128xf32>
    %cst_10 = arith.constant dense<0.000000e+00> : vector<8x128xf32>
    %11 = tpu.matmul %8, %9, %cst_10 {dimension_numbers = #tpu.dot_dimension_numbers<[1], [0], [0], [1], [0, 0, 1, 1], [], []>} : vector<8x128xbf16>, vector<128x128xbf16>, vector<8x128xf32> -> vector<8x128xf32>
    %12 = vector.broadcast %10 : vector<1x128xf32> to vector<8x128xf32>
    %13 = arith.addf %11, %12 : vector<8x128xf32>
    %cst_11 = arith.constant 0.000000e+00 : f32
    %14 = vector.broadcast %cst_11 : f32 to vector<8x128xf32>
    %15 = arith.maximumf %13, %14 : vector<8x128xf32>
    %16 = arith.truncf %15 : vector<8x128xf32> to vector<8x128xbf16>
    %c0_12 = arith.constant 0 : index
    %c0_13 = arith.constant 0 : index
    %17 = vector.load %arg6[%c0_12, %c0_13] : memref<128x128xbf16, #tpu.memory_space<vmem>>, vector<128x128xbf16>
    %c0_14 = arith.constant 0 : index
    %c0_15 = arith.constant 0 : index
    %18 = vector.load %arg7[%c0_14, %c0_15] : memref<1x128xf32, #tpu.memory_space<vmem>>, vector<1x128xf32>
    %cst_16 = arith.constant dense<0.000000e+00> : vector<8x128xf32>
    %19 = tpu.matmul %16, %17, %cst_16 {dimension_numbers = #tpu.dot_dimension_numbers<[1], [0], [0], [1], [0, 0, 1, 1], [], []>} : vector<8x128xbf16>, vector<128x128xbf16>, vector<8x128xf32> -> vector<8x128xf32>
    %20 = vector.broadcast %18 : vector<1x128xf32> to vector<8x128xf32>
    %21 = arith.addf %19, %20 : vector<8x128xf32>
    %22 = arith.truncf %21 : vector<8x128xf32> to vector<8x128xbf16>
    %c0_17 = arith.constant 0 : index
    %c0_18 = arith.constant 0 : index
    %23 = vector.load %arg8[%c0_17, %c0_18] : memref<8x128xbf16, #tpu.memory_space<vmem>>, vector<8x128xbf16>
    tpu.vector_store %arg8[%c0_17, %c0_18], %22 {strides = array<i32>} : memref<8x128xbf16, #tpu.memory_space<vmem>>, vector<8x128xbf16>,
    return
  }
  func.func @transform_0(%arg0: i32) -> (i32, i32) {
    %c0_i32 = arith.constant 0 : i32
    %c0_i32_0 = arith.constant 0 : i32
    return %arg0, %c0_i32 : i32, i32
  }
  func.func @transform_1(%arg0: i32) -> (i32, i32) {
    %c0_i32 = arith.constant 0 : i32
    %c0_i32_0 = arith.constant 0 : i32
    %c0_i32_1 = arith.constant 0 : i32
    return %c0_i32, %c0_i32_0 : i32, i32
  }
  func.func @transform_2(%arg0: i32) -> (i32, i32) {
    %c0_i32 = arith.constant 0 : i32
    %c0_i32_0 = arith.constant 0 : i32
    %c0_i32_1 = arith.constant 0 : i32
    return %c0_i32, %c0_i32_0 : i32, i32
  }
  func.func @transform_3(%arg0: i32) -> (i32, i32) {
    %c0_i32 = arith.constant 0 : i32
    %c0_i32_0 = arith.constant 0 : i32
    %c0_i32_1 = arith.constant 0 : i32
    return %c0_i32, %c0_i32_0 : i32, i32
  }
  func.func @transform_4(%arg0: i32) -> (i32, i32) {
    %c0_i32 = arith.constant 0 : i32
    %c0_i32_0 = arith.constant 0 : i32
    %c0_i32_1 = arith.constant 0 : i32
    return %c0_i32, %c0_i32_0 : i32, i32
  }
  func.func @transform_5(%arg0: i32) -> (i32, i32) {
    %c0_i32 = arith.constant 0 : i32
    %c0_i32_0 = arith.constant 0 : i32
    %c0_i32_1 = arith.constant 0 : i32
    return %c0_i32, %c0_i32_0 : i32, i32
  }
  func.func @transform_6(%arg0: i32) -> (i32, i32) {
    %c0_i32 = arith.constant 0 : i32
    %c0_i32_0 = arith.constant 0 : i32
    %c0_i32_1 = arith.constant 0 : i32
    return %c0_i32, %c0_i32_0 : i32, i32
  }
  func.func @transform_7(%arg0: i32) -> (i32, i32) {
    %c0_i32 = arith.constant 0 : i32
    %c0_i32_0 = arith.constant 0 : i32
    return %arg0, %c0_i32 : i32, i32
  }
}

</mosaic_0001>

<bundles_post_ra>
// kernel: mlp_forward.1
= control target key start
LH: loop header
LB: loop body
LE: loop exit
PB: predicated region body
PF: predicated region fallthrough
CT: control target
= control target key end

     0   :  { %12 = vsyncpa [#allocation3], 0  ;;  %s773_s0 = inlined_call_operand.vmem [shape: bf16[8,128], index: 0, kind: input, shape index: {}]   ;;  %s774_s1 = inlined_call_operand.hbm [shape: bf16[128,128], index: 1, kind: input, shape index: {}]   ;;  %s775_s2 = inlined_call_operand.vmem [shape: f32[1,128], index: 2, kind: input, shape index: {}]   ;;  %s776_s3 = inlined_call_operand.hbm [shape: bf16[128,128], index: 3, kind: input, shape index: {}]   ;;  %s777_s4 = inlined_call_operand.vmem [shape: f32[1,128], index: 4, kind: input, shape index: {}]   ;;  %s778_s5 = inlined_call_operand.hbm [shape: bf16[128,128], index: 5, kind: input, shape index: {}]   ;;  %s779_s6 = inlined_call_operand.vmem [shape: f32[1,128], index: 6, kind: input, shape index: {}]   ;;  %s780_s7 = inlined_call_operand.vmem [shape: bf16[8,128], index: 7, kind: output, shape index: {}]  }
   0x1   :  { %13 = vsyncpa [#allocation5], 0  ;;  %s629_s24 = smov [#allocation4]   ;;  %s630_s26 = smov [#allocation2]  }
   0x2   :  { %s35_s25 = sshll.u32 %s629_s24, 4  ;;  %s21_s27 = sshll.u32 %s630_s26, 4  ;;  %s36_s25 = int_to_ptr.vmem [resolvable:$true] %s35_s25  ;;  %s676_s27 = int_to_ptr.vmem [resolvable:$true] %s21_s27 }
   0x3   :  { %s559_s30 = scalar_lea.hbm %s776_s3, 1024 }
   0x4   :  { %p560_p0 = scmp.ne.s32.totalorder %s776_s3, %s559_s30  ;;  %p563_p1 = scmp.lt.u32.totalorder %s559_s30, %s776_s3 }
   0x6   :  { %p565_p2 = pnand %p563_p1, %p560_p0 }
   0x8   :  { %568 = shalt.err (!%p565_p2)
}
   0x9   :  { %s569_s12 = scalar_lea.vmem %s36_s25, 1024  ;;  %p574_p4 = scmp.lt.s32.totalorder %s36_s25, %s36_s25 }
   0xa   :  { %p570_p3 = scmp.ne.s32.totalorder %s36_s25, %s569_s12  ;;  %p575_p5 = scmp.lt.s32.totalorder %s569_s12, %s569_s12 }
   0xc   :  { %p576_p6 = por %p575_p5, %p574_p4 }
   0xe   :  { %p577_p7 = pnand %p576_p6, %p570_p3 }
  0x10   :  { %580 = shalt.err (!%p577_p7)
}
  0x11   :  { %s631_s13 = smov 64   ;;  %s632_s14 = smov 4  }
  0x12   :  { %41 = dma.hbm_to_vmem [thread:$0]  %s776_s3, 1024, %s36_s25, [#allocation5], %s631_s13, %s631_s13, %s632_s14  }
  0x13   :  { %s581_s19 = scalar_lea.hbm %s774_s1, 1024 }
  0x14   :  { %p582_p8 = scmp.ne.s32.totalorder %s774_s1, %s581_s19  ;;  %p585_p9 = scmp.lt.u32.totalorder %s581_s19, %s774_s1 }
  0x16   :  { %p587_p10 = pnand %p585_p9, %p582_p8 }
  0x18   :  { %590 = shalt.err (!%p587_p10)
}
  0x19   :  { %s591_s24 = scalar_lea.vmem %s676_s27, 1024  ;;  %p596_p12 = scmp.lt.s32.totalorder %s676_s27, %s676_s27 }
  0x1a   :  { %p592_p11 = scmp.ne.s32.totalorder %s676_s27, %s591_s24  ;;  %p597_p13 = scmp.lt.s32.totalorder %s591_s24, %s591_s24 }
  0x1c   :  { %p598_p0 = por %p597_p13, %p596_p12 }
  0x1e   :  { %p599_p1 = pnand %p598_p0, %p592_p11 }
  0x20   :  { %602 = shalt.err (!%p599_p1)
}
  0x21   :  { %27 = dma.hbm_to_vmem [thread:$0]  %s774_s1, 1024, %s676_s27, [#allocation3], %s631_s13, %s631_s13, %s632_s14  }
  0x22   :  { %s633_s26 = smov [#allocation6]   ;;  %s603_s8 = scalar_lea.hbm %s778_s5, 1024 }
  0x23   :  { %s49_s28 = sshll.u32 %s633_s26, 4  ;;  %p604_p2 = scmp.ne.s32.totalorder %s778_s5, %s603_s8  ;;  %s50_s28 = int_to_ptr.vmem [resolvable:$true] %s49_s28 }
  0x24   :  { %p607_p3 = scmp.lt.u32.totalorder %s603_s8, %s778_s5 }
  0x26   :  { %p609_p4 = pnand %p607_p3, %p604_p2 }
  0x28   :  { %612 = shalt.err (!%p609_p4)
}
  0x29   :  { %s613_s15 = scalar_lea.vmem %s50_s28, 1024  ;;  %p618_p6 = scmp.lt.s32.totalorder %s50_s28, %s50_s28 }
  0x2a   :  { %p614_p5 = scmp.ne.s32.totalorder %s50_s28, %s613_s15  ;;  %p619_p7 = scmp.lt.s32.totalorder %s613_s15, %s613_s15 }
  0x2c   :  { %p620_p8 = por %p619_p7, %p618_p6 }
  0x2e   :  { %p621_p9 = pnand %p620_p8, %p614_p5 }
  0x30   :  { %624 = shalt.err (!%p621_p9)
}
  0x31   :  { %55 = dma.hbm_to_vmem [thread:$0]  %s778_s5, 1024, %s50_s28, [#allocation5], %s631_s13, %s631_s13, %s632_s14  }
  0x32   :  { %625 = dma.done.wait [#allocation3], 1024  }
  0x33   :  { %626 = vsyncadd [#allocation3], 4294966272 }
  0x34   :  { %627 = dma.done.wait [#allocation5], 2048  }
  0x35   :  { %628 = vsyncadd [#allocation5], 4294965248  ;;  %v634_v0 = vmov 0.0   ;;  %vm635_vm0 = vmmov 0   ;;  %v535_v1 = vld [vmem:[#allocation2] sm:$0xff]   ;;  %v536_v2 = vld [vmem:[#allocation2 + $0x8] sm:$0xff]  }
  0x36   :  { %468 = vmatprep.subr.bf16.mxu0 %v634_v0  ;;  %484 = vmatprep.mubr.msk.bf16.mxu0 %vm635_vm0, %v634_v0  ;;  %v537_v3 = vld [vmem:[#allocation2 + $0x10] sm:$0xff]   ;;  %v543_v4 = vld [vmem:[#allocation4] sm:$0xff]   ;;  %v538_v5 = vld [vmem:[#allocation2 + $0x18] sm:$0xff]  }
  0x37   :  { %488 = vmatprep.subr.bf16.mxu1 %v634_v0  ;;  %504 = vmatprep.mubr.msk.bf16.mxu1 %vm635_vm0, %v634_v0  ;;  %v544_v6 = vld [vmem:[#allocation4 + $0x8] sm:$0xff]   ;;  %v539_v7 = vld [vmem:[#allocation2 + $0x20] sm:$0xff]   ;;  %v545_v8 = vld [vmem:[#allocation4 + $0x10] sm:$0xff]  }
  0x38   :  { %469 = vmatpush3.bf16.msra.mxu0 %v535_v1  ;;  %489 = vmatpush3.bf16.msra.mxu1 %v543_v4  ;;  %v540_v9 = vld [vmem:[#allocation2 + $0x28] sm:$0xff]   ;;  %v546_v10 = vld [vmem:[#allocation4 + $0x18] sm:$0xff]   ;;  %v541_v11 = vld [vmem:[#allocation2 + $0x30] sm:$0xff]  }
  0x39   :  { %470 = vmatprep.subr.bf16.mxu0 %v634_v0  ;;  %490 = vmatprep.subr.bf16.mxu1 %v634_v0  ;;  %v547_v12 = vld [vmem:[#allocation4 + $0x20] sm:$0xff]   ;;  %v542_v13 = vld [vmem:[#allocation2 + $0x38] sm:$0xff]   ;;  %v548_v14 = vld [vmem:[#allocation4 + $0x28] sm:$0xff]  }
  0x3a   :  { %v68_v15 = vld [vmem:[%s773_s0] sm:$0xf]  ;;  %v549_v16 = vld [vmem:[#allocation4 + $0x30] sm:$0xff]   ;;  %v550_v17 = vld [vmem:[#allocation4 + $0x38] sm:$0xff]  }
  0x3b   :  { %v551_v18 = vld [vmem:[#allocation6] sm:$0xff]   ;;  %v552_v19 = vld [vmem:[#allocation6 + $0x8] sm:$0xff]   ;;  %v553_v20 = vld [vmem:[#allocation6 + $0x10] sm:$0xff]  }
  0x3c   :  { %471 = vmatpush3.bf16.msra.mxu0 %v536_v2  ;;  %491 = vmatpush3.bf16.msra.mxu1 %v544_v6  ;;  %v554_v21 = vld [vmem:[#allocation6 + $0x18] sm:$0xff]   ;;  %v555_v22 = vld [vmem:[#allocation6 + $0x20] sm:$0xff]   ;;  %v556_v23 = vld [vmem:[#allocation6 + $0x28] sm:$0xff]  }
  0x3d   :  { %472 = vmatprep.subr.bf16.mxu0 %v634_v0  ;;  %492 = vmatprep.subr.bf16.mxu1 %v634_v0  ;;  %v414_v24 = vld [vmem:[%s775_s2] ss:$0 sm:$0xff]  ;;  %v557_v32 = vld [vmem:[#allocation6 + $0x30] sm:$0xff]   ;;  %v558_v33 = vld [vmem:[#allocation6 + $0x38] sm:$0xff]  }
  0x3e   :  { %v423_v34 = vld [vmem:[%s777_s4] ss:$0 sm:$0xff] }
  0x3f   :  { %v432_v42 = vld [vmem:[%s779_s6] ss:$0 sm:$0xff] }
  0x40   :  { %473 = vmatpush3.bf16.msra.mxu0 %v537_v3  ;;  %493 = vmatpush3.bf16.msra.mxu1 %v545_v8 }
  0x41   :  { %474 = vmatprep.subr.bf16.mxu0 %v634_v0  ;;  %494 = vmatprep.subr.bf16.mxu1 %v634_v0 }
  0x44   :  { %475 = vmatpush3.bf16.msra.mxu0 %v538_v5  ;;  %495 = vmatpush3.bf16.msra.mxu1 %v546_v10 }
  0x45   :  { %476 = vmatprep.subr.bf16.mxu0 %v634_v0  ;;  %496 = vmatprep.subr.bf16.mxu1 %v634_v0 }
  0x48   :  { %477 = vmatpush3.bf16.msra.mxu0 %v539_v7  ;;  %497 = vmatpush3.bf16.msra.mxu1 %v547_v12 }
  0x49   :  { %478 = vmatprep.subr.bf16.mxu0 %v634_v0  ;;  %498 = vmatprep.subr.bf16.mxu1 %v634_v0 }
  0x4c   :  { %479 = vmatpush3.bf16.msra.mxu0 %v540_v9  ;;  %499 = vmatpush3.bf16.msra.mxu1 %v548_v14 }
  0x4d   :  { %480 = vmatprep.subr.bf16.mxu0 %v634_v0  ;;  %500 = vmatprep.subr.bf16.mxu1 %v634_v0 }
  0x50   :  { %481 = vmatpush3.bf16.msra.mxu0 %v541_v11  ;;  %501 = vmatpush3.bf16.msra.mxu1 %v549_v16 }
  0x51   :  { %482 = vmatprep.subr.bf16.mxu0 %v634_v0  ;;  %502 = vmatprep.subr.bf16.mxu1 %v634_v0 }
  0x54   :  { %483 = vmatpush3.bf16.msra.mxu0 %v542_v13  ;;  %503 = vmatpush3.bf16.msra.mxu1 %v550_v17 }
  0x55   :  { %508 = vmatprep.subr.bf16.mxu0 %v634_v0 }
  0x57   :  { %485 = vmatmul.mubr.bf16.vlgmr.msra.gmra.mrb[0].mxu0 %v68_v15 }
  0x58   :  { %524 = vmatprep.mubr.msk.bf16.mxu0 %vm635_vm0, %v634_v0  ;;  %509 = vmatpush3.bf16.msra.mxu0 %v551_v18 }
  0x59   :  { %510 = vmatprep.subr.bf16.mxu0 %v634_v0 }
  0x5c   :  { %511 = vmatpush3.bf16.msra.mxu0 %v552_v19 }
  0x5d   :  { %512 = vmatprep.subr.bf16.mxu0 %v634_v0 }
  0x60   :  { %513 = vmatpush3.bf16.msra.mxu0 %v553_v20 }
  0x61   :  { %514 = vmatprep.subr.bf16.mxu0 %v634_v0 }
  0x64   :  { %515 = vmatpush3.bf16.msra.mxu0 %v554_v21 }
  0x65   :  { %516 = vmatprep.subr.bf16.mxu0 %v634_v0 }
  0x68   :  { %517 = vmatpush3.bf16.msra.mxu0 %v555_v22 }
  0x69   :  { %518 = vmatprep.subr.bf16.mxu0 %v634_v0 }
  0x6c   :  { %519 = vmatpush3.bf16.msra.mxu0 %v556_v23 }
  0x6d   :  { %520 = vmatprep.subr.bf16.mxu0 %v634_v0 }
  0x70   :  { %521 = vmatpush3.bf16.msra.mxu0 %v557_v32 }
  0x71   :  { %522 = vmatprep.subr.bf16.mxu0 %v634_v0 }
  0x74   :  { %523 = vmatpush3.bf16.msra.mxu0 %v558_v33 }
 0x12a   :  { %v174_v25 = vpop.f32.mrb[0].mxu0 }
 0x12b   :  { %v175_v26 = vadd.f32 %v414_v24, %v174_v25  ;;  %v486_v27 = vpop.f32.mrb[1].mxu0 }
 0x12c   :  { %v177_v28 = vpop.f32.mrb[2].mxu0 }
 0x12d   :  { %v180_v29 = vmax.f32 %v175_v26, 0.0  ;;  %v487_v30 = vpop.f32.mrb[3].mxu0 }
 0x12f   :  { %v181_v31 = vpack.c.bf16 %v180_v29, %v180_v29 }
 0x131   :  { %505 = vmatmul.mubr.bf16.vlgmr.msra.gmra.mrb[0].mxu1 %v181_v31 }
 0x204   :  { %v287_v35 = vpop.f32.mrb[0].mxu1 }
 0x205   :  { %v288_v36 = vadd.f32 %v423_v34, %v287_v35  ;;  %v506_v37 = vpop.f32.mrb[1].mxu1 }
 0x206   :  { %v290_v38 = vpop.f32.mrb[2].mxu1 }
 0x207   :  { %v293_v39 = vmax.f32 %v288_v36, 0.0  ;;  %v507_v40 = vpop.f32.mrb[3].mxu1 }
 0x209   :  { %v294_v41 = vpack.c.bf16 %v293_v39, %v293_v39 }
 0x20b   :  { %525 = vmatmul.mubr.bf16.vlgmr.msra.gmra.mrb[4].mxu0 %v294_v41 }
 0x2de   :  { %v400_v43 = vpop.f32.mrb[4].mxu0 }
 0x2df   :  { %v401_v44 = vadd.f32 %v432_v42, %v400_v43  ;;  %v526_v45 = vpop.f32.mrb[5].mxu0 }
 0x2e0   :  { %v403_v46 = vpop.f32.mrb[6].mxu0 }
 0x2e1   :  { %v406_v47 = vpack.c.bf16 %v401_v44, %v401_v44  ;;  %v527_v48 = vpop.f32.mrb[7].mxu0 }
 0x2e3   :  { %407 = vst [vmem:[%s780_s7] sm:$0xf] %v406_v47 }
 0x2e4   :  { %412 = vsyncpa [#allocation3], 1 }
 0x2e5   :  { %413 = vsyncpa [#allocation5], 1 }

</bundles_post_ra>
